<compile_context>
chip_gen: v6e
topology: v6e:2x2x1
jax: 0.10.0
libtpu: 0.0.40
codegen_flags: <defaults>
</compile_context>

<pallas_src>
import functools

import jax
import jax.numpy as jnp
from jax.experimental import pallas as pl
from jax.experimental.pallas import tpu as pltpu


def _round_up(x, m):
    return ((x + m - 1) // m) * m


def _vae_kernel(
    x_ref, eps_ref,
    w1_ref, b1_ref,
    wh_ref, bh_ref,
    wd1_ref, bd1_ref,
    wd2_ref, bd2_ref,
    recon_ref, heads_ref,
    *, latent_pad,
):
    # x arrives f32 (no extra wrapper cast pass); cast to bf16 on the VPU for the MXU.
    x = x_ref[...].astype(jnp.bfloat16)     # [TB, D_pad]
    eps = eps_ref[...]                       # f32 [TB, L_pad]

    # ---- Encoder first layer: h = relu(x @ W1 + b1)  (MXU bf16, f32 accumulate) ----
    h = jnp.dot(x, w1_ref[...], preferred_element_type=jnp.float32) + b1_ref[...]
    h = jnp.maximum(h, 0.0)

    # ---- Fused mu / log_var heads: single matmul -> [TB, 2*L_pad] ----
    heads = jnp.dot(h.astype(jnp.bfloat16), wh_ref[...],
                    preferred_element_type=jnp.float32) + bh_ref[...]
    mu = heads[:, :latent_pad]               # 128-aligned static slices
    log_var = heads[:, latent_pad:]

    # ---- Reparameterization (f32 VPU/EUP): z = eps * exp(0.5 * log_var) + mu ----
    # Padded latent lanes: mu = log_var = 0 -> z = eps there; harmless because wd1's padded
    # *rows* are zero, so those lanes contribute nothing to the decoder.
    z = eps * jnp.exp(0.5 * log_var) + mu

    # ---- Decoder: sigmoid(relu(z @ Wd1 + bd1) @ Wd2 + bd2) ----
    d1 = jnp.dot(z.astype(jnp.bfloat16), wd1_ref[...],
                 preferred_element_type=jnp.float32) + bd1_ref[...]
    d1 = jnp.maximum(d1, 0.0)
    logits = jnp.dot(d1.astype(jnp.bfloat16), wd2_ref[...],
                     preferred_element_type=jnp.float32) + bd2_ref[...]
    recon = jax.nn.sigmoid(logits)

    # Lane-dense stores (last dims are multiples of 128).
    recon_ref[...] = recon.astype(recon_ref.dtype)
    heads_ref[...] = heads.astype(heads_ref.dtype)


def init_params(key, input_size, middle_layer_size, latent_dim):
    """Deterministic synthetic init matching nn.Linear fan-in bounds.

    Weights are stored transposed relative to nn.Linear: [in_features, out_features].
    Biases are 2-D [1, out_features].
    """
    def linear(k, fan_in, fan_out):
        kw, kb = jax.random.split(k)
        bound = 1.0 / jnp.sqrt(fan_in)
        w = jax.random.uniform(kw, (fan_in, fan_out), jnp.float32, -bound, bound)
        b = jax.random.uniform(kb, (1, fan_out), jnp.float32, -bound, bound)
        return w, b

    keys = jax.random.split(key, 5)
    w1, b1 = linear(keys[0], input_size, middle_layer_size)        # encoder.first_layer
    wmu, bmu = linear(keys[1], middle_layer_size, latent_dim)      # encoder.mu_net
    wsig, bsig = linear(keys[2], middle_layer_size, latent_dim)    # encoder.sigma_net
    wd1, bd1 = linear(keys[3], latent_dim, middle_layer_size)      # decoder[0]
    wd2, bd2 = linear(keys[4], middle_layer_size, input_size)      # decoder[2]
    return {
        "w1": w1, "b1": b1,
        "wmu": wmu, "bmu": bmu,
        "wsig": wsig, "bsig": bsig,
        "wd1": wd1, "bd1": bd1,
        "wd2": wd2, "bd2": bd2,
    }


def pack_params(params, input_size, middle_layer_size, latent_dim):
    """One-time wrapper-side packing: pad every feature dim to a multiple of 128,
    fuse the mu/sigma head weights into a single [H_pad, 2*L_pad] matrix, and cast
    all matmul weights to bfloat16 (biases stay f32, added after f32 accumulation)."""
    D_pad = _round_up(input_size, 128)
    H_pad = _round_up(middle_layer_size, 128)
    L_pad = _round_up(latent_dim, 128)

    def pad2(a, rows, cols):
        return jnp.pad(a, ((0, rows - a.shape[0]), (0, cols - a.shape[1])))

    w1 = pad2(params["w1"], D_pad, H_pad).astype(jnp.bfloat16)
    b1 = pad2(params["b1"], 1, H_pad)

    wmu = pad2(params["wmu"], H_pad, L_pad)
    wsig = pad2(params["wsig"], H_pad, L_pad)
    wh = jnp.concatenate([wmu, wsig], axis=1).astype(jnp.bfloat16)   # [H_pad, 2*L_pad]
    bmu = pad2(params["bmu"], 1, L_pad)
    bsig = pad2(params["bsig"], 1, L_pad)
    bh = jnp.concatenate([bmu, bsig], axis=1)                        # [1, 2*L_pad]

    # wd1 padded rows MUST stay zero: they kill the garbage latent lanes of z (see kernel).
    wd1 = pad2(params["wd1"], L_pad, H_pad).astype(jnp.bfloat16)
    bd1 = pad2(params["bd1"], 1, H_pad)
    wd2 = pad2(params["wd2"], H_pad, D_pad).astype(jnp.bfloat16)
    bd2 = pad2(params["bd2"], 1, D_pad)

    return {
        "w1": w1, "b1": b1,
        "wh": wh, "bh": bh,
        "wd1": wd1, "bd1": bd1,
        "wd2": wd2, "bd2": bd2,
    }


@functools.partial(
    jax.jit, static_argnames=("tile_b", "recon_dtype", "single_buffer_weights"))
def vae_forward(x, eps, packed, tile_b=256, recon_dtype=jnp.float32,
                single_buffer_weights=True):
    """Full VAE forward in one fused Pallas kernel, tiled over the batch.

    x:      [B, input_size] f32
    eps:    [B, latent_dim] f32  (standard-normal noise, supplied from outside)
    packed: output of pack_params (padded / head-fused / bf16 weights)
    Returns (x_reconstructed [B, input_size], mu [B, latent_dim], log_var [B, latent_dim]).
    """
    B, input_size = x.shape
    latent_dim = eps.shape[1]

    D_pad, H_pad = packed["w1"].shape
    L_pad = packed["wd1"].shape[0]

    # ---- Batch tile policy ----
    # Multiple of 8 (sublane); capped at tile_b (256 keeps the footprint inside v5e's 16 MiB
    # scoped default; raise tile_b on v6e for big batches).  If everything fits in a single
    # step but the batch can be split, halve the tile so v7x's two TensorCores both get work.
    TB = min(_round_up(B, 8), tile_b)
    if B >= 16 and _round_up(B, TB) // TB < 2:
        TB = _round_up((B + 1) // 2, 8)
    B_pad = _round_up(B, TB)

    # ---- Pad inputs only when necessary (single jnp.pad, no extra cast pass) ----
    # x padding must be zero (padded feature columns of w1 are zero anyway, this keeps h exact).
    # eps padding value is irrelevant for correctness (wd1 padded rows are zero); zeros are fine.
    x_p = x if (B == B_pad and input_size == D_pad) else jnp.pad(
        x, ((0, B_pad - B), (0, D_pad - input_size)))
    eps_p = eps if (B == B_pad and latent_dim == L_pad) else jnp.pad(
        eps, ((0, B_pad - B), (0, L_pad - latent_dim)))

    grid = (B_pad // TB,)
    const = lambda i: (0, 0)           # weights/biases: same block every step (VMEM-resident)
    batched = lambda i: (i, 0)         # activations: tile over batch

    # Constant-index_map operands are re-fetched identically every step; single-buffering them
    # halves their VMEM cost.  Fallback path (single_buffer_weights=False) omits pipeline_mode.
    if single_buffer_weights:
        def w_spec(shape):
            return pl.BlockSpec(shape, const, pipeline_mode=pl.Buffered(1))
    else:
        def w_spec(shape):
            return pl.BlockSpec(shape, const)

    # ---- VMEM budget (with margin) and cost estimate ----
    wbuf = 1 if single_buffer_weights else 2
    w_elems = D_pad * H_pad + H_pad * 2 * L_pad + L_pad * H_pad + H_pad * D_pad
    b_elems = H_pad + 2 * L_pad + H_pad + D_pad
    recon_isize = jnp.dtype(recon_dtype).itemsize
    vmem_est = (
        wbuf * (2 * w_elems + 4 * b_elems)                       # resident weights + biases
        + 2 * TB * (4 * D_pad + 4 * L_pad)                       # double-buffered x, eps (f32)
        + 2 * TB * (recon_isize * D_pad + 4 * 2 * L_pad)         # double-buffered outputs
        + 4 * TB * (2 * H_pad + 2 * L_pad + D_pad)               # live f32 intermediates
    )
    vmem_limit = min(max(int(1.5 * vmem_est), 32 * 1024 * 1024), 60 * 1024 * 1024)

    cost = pl.CostEstimate(
        flops=2 * B_pad * w_elems,
        transcendentals=B_pad * (L_pad + D_pad),                 # exp in reparam + sigmoid
        bytes_accessed=(
            4 * B_pad * (D_pad + L_pad)                          # x, eps reads (f32)
            + 2 * w_elems + 4 * b_elems                          # weights (bf16) + biases (f32)
            + recon_isize * B_pad * D_pad + 4 * B_pad * 2 * L_pad  # outputs
        ),
    )

    kernel = functools.partial(_vae_kernel, latent_pad=L_pad)

    recon_p, heads_p = pl.pallas_call(
        kernel,
        out_shape=(
            jax.ShapeDtypeStruct((B_pad, D_pad), recon_dtype),        # recon (padded)
            jax.ShapeDtypeStruct((B_pad, 2 * L_pad), jnp.float32),    # mu | log_var slab
        ),
        grid_spec=pltpu.PrefetchScalarGridSpec(
            num_scalar_prefetch=0,
            grid=grid,
            in_specs=[
                pl.BlockSpec((TB, D_pad), batched),        # x   (f32, cast in kernel)
                pl.BlockSpec((TB, L_pad), batched),        # eps (f32)
                w_spec((D_pad, H_pad)),                    # w1
                w_spec((1, H_pad)),                        # b1
                w_spec((H_pad, 2 * L_pad)),                # wh (fused mu|sigma)
                w_spec((1, 2 * L_pad)),                    # bh
                w_spec((L_pad, H_pad)),                    # wd1
                w_spec((1, H_pad)),                        # bd1
                w_spec((H_pad, D_pad)),                    # wd2
                w_spec((1, D_pad)),                        # bd2
            ],
            out_specs=[
                pl.BlockSpec((TB, D_pad), batched),
                pl.BlockSpec((TB, 2 * L_pad), batched),
            ],
        ),
        compiler_params=pltpu.CompilerParams(
            dimension_semantics=("parallel",),
            vmem_limit_bytes=vmem_limit,
        ),
        cost_estimate=cost,
    )(x_p, eps_p,
      packed["w1"], packed["b1"],
      packed["wh"], packed["bh"],
      packed["wd1"], packed["bd1"],
      packed["wd2"], packed["bd2"])

    # Slice only when padding actually happened (avoids an extra HBM pass over the outputs).
    recon = recon_p if (B == B_pad and input_size == D_pad) else recon_p[:B, :input_size]
    mu = heads_p[:B, :latent_dim]
    log_var = heads_p[:B, L_pad:L_pad + latent_dim]
    return recon, mu, log_var


def _reference_forward(x, eps, p):
    """Plain-JAX f32 reference (mirrors the PyTorch forward)."""
    h = jnp.maximum(x @ p["w1"] + p["b1"], 0.0)
    mu = h @ p["wmu"] + p["bmu"]
    log_var = h @ p["wsig"] + p["bsig"]
    z = eps * jnp.exp(0.5 * log_var) + mu
    d1 = jnp.maximum(z @ p["wd1"] + p["bd1"], 0.0)
    recon = jax.nn.sigmoid(d1 @ p["wd2"] + p["bd2"])
    return recon, mu, log_var


if __name__ == "__main__":
    # Small shapes consistent with the module: x is [batch, input_size].
    batch = 8
    input_size = 64
    middle_layer_size = 32
    latent_dim = 16

    root = jax.random.PRNGKey(0)
    k_params, k_x, k_eps = jax.random.split(root, 3)

    params = init_params(k_params, input_size, middle_layer_size, latent_dim)
    packed = pack_params(params, input_size, middle_layer_size, latent_dim)

    x = jax.random.uniform(k_x, (batch, input_size), jnp.float32)      # MNIST-like data in [0,1]
    # TODO(synk): torch.randn_like inside sampling() is replaced by externally supplied eps
    # (JAX is functional); semantics of z = eps*exp(0.5*log_var)+mu are preserved.
    eps = jax.random.normal(k_eps, (batch, latent_dim), jnp.float32)

    try:
        recon, mu, log_var = vae_forward(x, eps, packed)
        jax.block_until_ready((recon, mu, log_var))
    except Exception:
        # Fallback for Pallas versions that reject pipeline_mode=pl.Buffered on pallas_call
        # BlockSpecs: identical kernel, weights double-buffered instead.
        recon, mu, log_var = vae_forward(x, eps, packed, single_buffer_weights=False)
        jax.block_until_ready((recon, mu, log_var))

    # Sanity check against the f32 pure-JAX reference (bf16 MXU operands -> loose tolerance).
    r_ref, mu_ref, lv_ref = _reference_forward(x, eps, params)
    assert recon.shape == (batch, input_size)
    assert mu.shape == (batch, latent_dim)
    assert log_var.shape == (batch, latent_dim)
    assert jnp.allclose(recon, r_ref, atol=3e-2, rtol=3e-2)
    assert jnp.allclose(mu, mu_ref, atol=3e-2, rtol=3e-2)
    assert jnp.allclose(log_var, lv_ref, atol=3e-2, rtol=3e-2)

    print("KERNEL_OK")
</pallas_src>

<mosaic_0001>
module attributes {stable_mosaic.version = 11 : i64} {
  func.func @_vae_kernel(%arg0: i32, %arg1: memref<8x128xf32, #tpu.memory_space<vmem>>, %arg2: memref<8x128xf32, #tpu.memory_space<vmem>>, %arg3: memref<128x128xbf16, #tpu.memory_space<vmem>>, %arg4: memref<1x128xf32, #tpu.memory_space<vmem>>, %arg5: memref<128x256xbf16, #tpu.memory_space<vmem>>, %arg6: memref<1x256xf32, #tpu.memory_space<vmem>>, %arg7: memref<128x128xbf16, #tpu.memory_space<vmem>>, %arg8: memref<1x128xf32, #tpu.memory_space<vmem>>, %arg9: memref<128x128xbf16, #tpu.memory_space<vmem>>, %arg10: memref<1x128xf32, #tpu.memory_space<vmem>>, %arg11: memref<8x128xf32, #tpu.memory_space<vmem>>, %arg12: memref<8x256xf32, #tpu.memory_space<vmem>>) attributes {dimension_semantics = [#tpu.dimension_semantics<parallel>], iteration_bounds = array<i64: 1>, scalar_prefetch = 0 : i64, scratch_operands = 0 : i64, tpu.core_type = #tpu.core_type<tc>, window_params = [{transform_indices = @transform_0, window_bounds = array<i64: 8, 128>}, {transform_indices = @transform_1, window_bounds = array<i64: 8, 128>}, {pipeline_mode = #tpu.pipeline_mode<synchronous>, transform_indices = @transform_2, window_bounds = array<i64: 128, 128>}, {pipeline_mode = #tpu.pipeline_mode<synchronous>, transform_indices = @transform_3, window_bounds = array<i64: 1, 128>}, {pipeline_mode = #tpu.pipeline_mode<synchronous>, transform_indices = @transform_4, window_bounds = array<i64: 128, 256>}, {pipeline_mode = #tpu.pipeline_mode<synchronous>, transform_indices = @transform_5, window_bounds = array<i64: 1, 256>}, {pipeline_mode = #tpu.pipeline_mode<synchronous>, transform_indices = @transform_6, window_bounds = array<i64: 128, 128>}, {pipeline_mode = #tpu.pipeline_mode<synchronous>, transform_indices = @transform_7, window_bounds = array<i64: 1, 128>}, {pipeline_mode = #tpu.pipeline_mode<synchronous>, transform_indices = @transform_8, window_bounds = array<i64: 128, 128>}, {pipeline_mode = #tpu.pipeline_mode<synchronous>, transform_indices = @transform_9, window_bounds = array<i64: 1, 128>}, {transform_indices = @transform_10, window_bounds = array<i64: 8, 128>}, {transform_indices = @transform_11, window_bounds = array<i64: 8, 256>}]} {
    %c0 = arith.constant 0 : index
    %c0_0 = arith.constant 0 : index
    %0 = vector.load %arg1[%c0, %c0_0] : memref<8x128xf32, #tpu.memory_space<vmem>>, vector<8x128xf32>
    %1 = arith.truncf %0 : vector<8x128xf32> to vector<8x128xbf16>
    %c0_1 = arith.constant 0 : index
    %c0_2 = arith.constant 0 : index
    %2 = vector.load %arg2[%c0_1, %c0_2] : memref<8x128xf32, #tpu.memory_space<vmem>>, vector<8x128xf32>
    %c0_3 = arith.constant 0 : index
    %c0_4 = arith.constant 0 : index
    %3 = vector.load %arg3[%c0_3, %c0_4] : memref<128x128xbf16, #tpu.memory_space<vmem>>, vector<128x128xbf16>
    %cst = arith.constant dense<0.000000e+00> : vector<8x128xf32>
    %4 = tpu.matmul %1, %3, %cst {dimension_numbers = #tpu.dot_dimension_numbers<[1], [0], [0], [1], [0, 0, 1, 1], [], []>} : vector<8x128xbf16>, vector<128x128xbf16>, vector<8x128xf32> -> vector<8x128xf32>
    %c0_5 = arith.constant 0 : index
    %c0_6 = arith.constant 0 : index
    %5 = vector.load %arg4[%c0_5, %c0_6] : memref<1x128xf32, #tpu.memory_space<vmem>>, vector<1x128xf32>
    %6 = vector.broadcast %5 : vector<1x128xf32> to vector<8x128xf32>
    %7 = arith.addf %4, %6 : vector<8x128xf32>
    %cst_7 = arith.constant 0.000000e+00 : f32
    %8 = vector.broadcast %cst_7 : f32 to vector<8x128xf32>
    %9 = arith.maximumf %7, %8 : vector<8x128xf32>
    %10 = arith.truncf %9 : vector<8x128xf32> to vector<8x128xbf16>
    %c0_8 = arith.constant 0 : index
    %c0_9 = arith.constant 0 : index
    %11 = vector.load %arg5[%c0_8, %c0_9] : memref<128x256xbf16, #tpu.memory_space<vmem>>, vector<128x256xbf16>
    %cst_10 = arith.constant dense<0.000000e+00> : vector<8x256xf32>
    %12 = tpu.matmul %10, %11, %cst_10 {dimension_numbers = #tpu.dot_dimension_numbers<[1], [0], [0], [1], [0, 0, 1, 1], [], []>} : vector<8x128xbf16>, vector<128x256xbf16>, vector<8x256xf32> -> vector<8x256xf32>
    %c0_11 = arith.constant 0 : index
    %c0_12 = arith.constant 0 : index
    %13 = vector.load %arg6[%c0_11, %c0_12] : memref<1x256xf32, #tpu.memory_space<vmem>>, vector<1x256xf32>
    %14 = vector.broadcast %13 : vector<1x256xf32> to vector<8x256xf32>
    %15 = arith.addf %12, %14 : vector<8x256xf32>
    %16 = vector.extract_strided_slice %15 {offsets = [0, 0], sizes = [8, 128], strides = [1, 1]} : vector<8x256xf32> to vector<8x128xf32>
    %17 = vector.extract_strided_slice %15 {offsets = [0, 128], sizes = [8, 128], strides = [1, 1]} : vector<8x256xf32> to vector<8x128xf32>
    %cst_13 = arith.constant 5.000000e-01 : f32
    %18 = vector.broadcast %cst_13 : f32 to vector<8x128xf32>
    %19 = arith.mulf %18, %17 : vector<8x128xf32>
    %20 = math.exp %19 : vector<8x128xf32>
    %21 = arith.mulf %2, %20 : vector<8x128xf32>
    %22 = arith.addf %21, %16 : vector<8x128xf32>
    %23 = arith.truncf %22 : vector<8x128xf32> to vector<8x128xbf16>
    %c0_14 = arith.constant 0 : index
    %c0_15 = arith.constant 0 : index
    %24 = vector.load %arg7[%c0_14, %c0_15] : memref<128x128xbf16, #tpu.memory_space<vmem>>, vector<128x128xbf16>
    %cst_16 = arith.constant dense<0.000000e+00> : vector<8x128xf32>
    %25 = tpu.matmul %23, %24, %cst_16 {dimension_numbers = #tpu.dot_dimension_numbers<[1], [0], [0], [1], [0, 0, 1, 1], [], []>} : vector<8x128xbf16>, vector<128x128xbf16>, vector<8x128xf32> -> vector<8x128xf32>
    %c0_17 = arith.constant 0 : index
    %c0_18 = arith.constant 0 : index
    %26 = vector.load %arg8[%c0_17, %c0_18] : memref<1x128xf32, #tpu.memory_space<vmem>>, vector<1x128xf32>
    %27 = vector.broadcast %26 : vector<1x128xf32> to vector<8x128xf32>
    %28 = arith.addf %25, %27 : vector<8x128xf32>
    %cst_19 = arith.constant 0.000000e+00 : f32
    %29 = vector.broadcast %cst_19 : f32 to vector<8x128xf32>
    %30 = arith.maximumf %28, %29 : vector<8x128xf32>
    %31 = arith.truncf %30 : vector<8x128xf32> to vector<8x128xbf16>
    %c0_20 = arith.constant 0 : index
    %c0_21 = arith.constant 0 : index
    %32 = vector.load %arg9[%c0_20, %c0_21] : memref<128x128xbf16, #tpu.memory_space<vmem>>, vector<128x128xbf16>
    %cst_22 = arith.constant dense<0.000000e+00> : vector<8x128xf32>
    %33 = tpu.matmul %31, %32, %cst_22 {dimension_numbers = #tpu.dot_dimension_numbers<[1], [0], [0], [1], [0, 0, 1, 1], [], []>} : vector<8x128xbf16>, vector<128x128xbf16>, vector<8x128xf32> -> vector<8x128xf32>
    %c0_23 = arith.constant 0 : index
    %c0_24 = arith.constant 0 : index
    %34 = vector.load %arg10[%c0_23, %c0_24] : memref<1x128xf32, #tpu.memory_space<vmem>>, vector<1x128xf32>
    %35 = vector.broadcast %34 : vector<1x128xf32> to vector<8x128xf32>
    %36 = arith.addf %33, %35 : vector<8x128xf32>
    %37 = arith.negf %36 : vector<8x128xf32>
    %38 = math.exp %37 : vector<8x128xf32>
    %cst_25 = arith.constant 1.000000e+00 : f32
    %39 = vector.broadcast %cst_25 : f32 to vector<8x128xf32>
    %40 = arith.addf %39, %38 : vector<8x128xf32>
    %41 = arith.divf %39, %40 : vector<8x128xf32>
    %c0_26 = arith.constant 0 : index
    %c0_27 = arith.constant 0 : index
    %42 = vector.load %arg11[%c0_26, %c0_27] : memref<8x128xf32, #tpu.memory_space<vmem>>, vector<8x128xf32>
    tpu.vector_store %arg11[%c0_26, %c0_27], %41 {strides = array<i32>} : memref<8x128xf32, #tpu.memory_space<vmem>>, vector<8x128xf32>,
    %c0_28 = arith.constant 0 : index
    %c0_29 = arith.constant 0 : index
    %43 = vector.load %arg12[%c0_28, %c0_29] : memref<8x256xf32, #tpu.memory_space<vmem>>, vector<8x256xf32>
    tpu.vector_store %arg12[%c0_28, %c0_29], %15 {strides = array<i32>} : memref<8x256xf32, #tpu.memory_space<vmem>>, vector<8x256xf32>,
    return
  }
  func.func @transform_0(%arg0: i32) -> (i32, i32) {
    %c0_i32 = arith.constant 0 : i32
    %c0_i32_0 = arith.constant 0 : i32
    return %arg0, %c0_i32 : i32, i32
  }
  func.func @transform_1(%arg0: i32) -> (i32, i32) {
    %c0_i32 = arith.constant 0 : i32
    %c0_i32_0 = arith.constant 0 : i32
    return %arg0, %c0_i32 : i32, i32
  }
  func.func @transform_2(%arg0: i32) -> (i32, i32) {
    %c0_i32 = arith.constant 0 : i32
    %c0_i32_0 = arith.constant 0 : i32
    %c0_i32_1 = arith.constant 0 : i32
    return %c0_i32, %c0_i32_0 : i32, i32
  }
  func.func @transform_3(%arg0: i32) -> (i32, i32) {
    %c0_i32 = arith.constant 0 : i32
    %c0_i32_0 = arith.constant 0 : i32
    %c0_i32_1 = arith.constant 0 : i32
    return %c0_i32, %c0_i32_0 : i32, i32
  }
  func.func @transform_4(%arg0: i32) -> (i32, i32) {
    %c0_i32 = arith.constant 0 : i32
    %c0_i32_0 = arith.constant 0 : i32
    %c0_i32_1 = arith.constant 0 : i32
    return %c0_i32, %c0_i32_0 : i32, i32
  }
  func.func @transform_5(%arg0: i32) -> (i32, i32) {
    %c0_i32 = arith.constant 0 : i32
    %c0_i32_0 = arith.constant 0 : i32
    %c0_i32_1 = arith.constant 0 : i32
    return %c0_i32, %c0_i32_0 : i32, i32
  }
  func.func @transform_6(%arg0: i32) -> (i32, i32) {
    %c0_i32 = arith.constant 0 : i32
    %c0_i32_0 = arith.constant 0 : i32
    %c0_i32_1 = arith.constant 0 : i32
    return %c0_i32, %c0_i32_0 : i32, i32
  }
  func.func @transform_7(%arg0: i32) -> (i32, i32) {
    %c0_i32 = arith.constant 0 : i32
    %c0_i32_0 = arith.constant 0 : i32
    %c0_i32_1 = arith.constant 0 : i32
    return %c0_i32, %c0_i32_0 : i32, i32
  }
  func.func @transform_8(%arg0: i32) -> (i32, i32) {
    %c0_i32 = arith.constant 0 : i32
    %c0_i32_0 = arith.constant 0 : i32
    %c0_i32_1 = arith.constant 0 : i32
    return %c0_i32, %c0_i32_0 : i32, i32
  }
  func.func @transform_9(%arg0: i32) -> (i32, i32) {
    %c0_i32 = arith.constant 0 : i32
    %c0_i32_0 = arith.constant 0 : i32
    %c0_i32_1 = arith.constant 0 : i32
    return %c0_i32, %c0_i32_0 : i32, i32
  }
  func.func @transform_10(%arg0: i32) -> (i32, i32) {
    %c0_i32 = arith.constant 0 : i32
    %c0_i32_0 = arith.constant 0 : i32
    return %arg0, %c0_i32 : i32, i32
  }
  func.func @transform_11(%arg0: i32) -> (i32, i32) {
    %c0_i32 = arith.constant 0 : i32
    %c0_i32_0 = arith.constant 0 : i32
    return %arg0, %c0_i32 : i32, i32
  }
}

module attributes {stable_mosaic.version = 11 : i64} {
  func.func @_vae_kernel(%arg0: i32, %arg1: memref<8x128xf32, #tpu.memory_space<vmem>>, %arg2: memref<8x128xf32, #tpu.memory_space<vmem>>, %arg3: memref<128x128xbf16, #tpu.memory_space<vmem>>, %arg4: memref<1x128xf32, #tpu.memory_space<vmem>>, %arg5: memref<128x256xbf16, #tpu.memory_space<vmem>>, %arg6: memref<1x256xf32, #tpu.memory_space<vmem>>, %arg7: memref<128x128xbf16, #tpu.memory_space<vmem>>, %arg8: memref<1x128xf32, #tpu.memory_space<vmem>>, %arg9: memref<128x128xbf16, #tpu.memory_space<vmem>>, %arg10: memref<1x128xf32, #tpu.memory_space<vmem>>, %arg11: memref<8x128xf32, #tpu.memory_space<vmem>>, %arg12: memref<8x256xf32, #tpu.memory_space<vmem>>) attributes {dimension_semantics = [#tpu.dimension_semantics<parallel>], iteration_bounds = array<i64: 1>, scalar_prefetch = 0 : i64, scratch_operands = 0 : i64, tpu.core_type = #tpu.core_type<tc>, window_params = [{transform_indices = @transform_0, window_bounds = array<i64: 8, 128>}, {transform_indices = @transform_1, window_bounds = array<i64: 8, 128>}, {pipeline_mode = #tpu.pipeline_mode<synchronous>, transform_indices = @transform_2, window_bounds = array<i64: 128, 128>}, {pipeline_mode = #tpu.pipeline_mode<synchronous>, transform_indices = @transform_3, window_bounds = array<i64: 1, 128>}, {pipeline_mode = #tpu.pipeline_mode<synchronous>, transform_indices = @transform_4, window_bounds = array<i64: 128, 256>}, {pipeline_mode = #tpu.pipeline_mode<synchronous>, transform_indices = @transform_5, window_bounds = array<i64: 1, 256>}, {pipeline_mode = #tpu.pipeline_mode<synchronous>, transform_indices = @transform_6, window_bounds = array<i64: 128, 128>}, {pipeline_mode = #tpu.pipeline_mode<synchronous>, transform_indices = @transform_7, window_bounds = array<i64: 1, 128>}, {pipeline_mode = #tpu.pipeline_mode<synchronous>, transform_indices = @transform_8, window_bounds = array<i64: 128, 128>}, {pipeline_mode = #tpu.pipeline_mode<synchronous>, transform_indices = @transform_9, window_bounds = array<i64: 1, 128>}, {transform_indices = @transform_10, window_bounds = array<i64: 8, 128>}, {transform_indices = @transform_11, window_bounds = array<i64: 8, 256>}]} {
    %c0 = arith.constant 0 : index
    %c0_0 = arith.constant 0 : index
    %0 = vector.load %arg1[%c0, %c0_0] : memref<8x128xf32, #tpu.memory_space<vmem>>, vector<8x128xf32>
    %1 = arith.truncf %0 : vector<8x128xf32> to vector<8x128xbf16>
    %c0_1 = arith.constant 0 : index
    %c0_2 = arith.constant 0 : index
    %2 = vector.load %arg2[%c0_1, %c0_2] : memref<8x128xf32, #tpu.memory_space<vmem>>, vector<8x128xf32>
    %c0_3 = arith.constant 0 : index
    %c0_4 = arith.constant 0 : index
    %3 = vector.load %arg3[%c0_3, %c0_4] : memref<128x128xbf16, #tpu.memory_space<vmem>>, vector<128x128xbf16>
    %cst = arith.constant dense<0.000000e+00> : vector<8x128xf32>
    %4 = tpu.matmul %1, %3, %cst {dimension_numbers = #tpu.dot_dimension_numbers<[1], [0], [0], [1], [0, 0, 1, 1], [], []>} : vector<8x128xbf16>, vector<128x128xbf16>, vector<8x128xf32> -> vector<8x128xf32>
    %c0_5 = arith.constant 0 : index
    %c0_6 = arith.constant 0 : index
    %5 = vector.load %arg4[%c0_5, %c0_6] : memref<1x128xf32, #tpu.memory_space<vmem>>, vector<1x128xf32>
    %6 = vector.broadcast %5 : vector<1x128xf32> to vector<8x128xf32>
    %7 = arith.addf %4, %6 : vector<8x128xf32>
    %cst_7 = arith.constant 0.000000e+00 : f32
    %8 = vector.broadcast %cst_7 : f32 to vector<8x128xf32>
    %9 = arith.maximumf %7, %8 : vector<8x128xf32>
    %10 = arith.truncf %9 : vector<8x128xf32> to vector<8x128xbf16>
    %c0_8 = arith.constant 0 : index
    %c0_9 = arith.constant 0 : index
    %11 = vector.load %arg5[%c0_8, %c0_9] : memref<128x256xbf16, #tpu.memory_space<vmem>>, vector<128x256xbf16>
    %cst_10 = arith.constant dense<0.000000e+00> : vector<8x256xf32>
    %12 = tpu.matmul %10, %11, %cst_10 {dimension_numbers = #tpu.dot_dimension_numbers<[1], [0], [0], [1], [0, 0, 1, 1], [], []>} : vector<8x128xbf16>, vector<128x256xbf16>, vector<8x256xf32> -> vector<8x256xf32>
    %c0_11 = arith.constant 0 : index
    %c0_12 = arith.constant 0 : index
    %13 = vector.load %arg6[%c0_11, %c0_12] : memref<1x256xf32, #tpu.memory_space<vmem>>, vector<1x256xf32>
    %14 = vector.broadcast %13 : vector<1x256xf32> to vector<8x256xf32>
    %15 = arith.addf %12, %14 : vector<8x256xf32>
    %16 = vector.extract_strided_slice %15 {offsets = [0, 0], sizes = [8, 128], strides = [1, 1]} : vector<8x256xf32> to vector<8x128xf32>
    %17 = vector.extract_strided_slice %15 {offsets = [0, 128], sizes = [8, 128], strides = [1, 1]} : vector<8x256xf32> to vector<8x128xf32>
    %cst_13 = arith.constant 5.000000e-01 : f32
    %18 = vector.broadcast %cst_13 : f32 to vector<8x128xf32>
    %19 = arith.mulf %18, %17 : vector<8x128xf32>
    %20 = math.exp %19 : vector<8x128xf32>
    %21 = arith.mulf %2, %20 : vector<8x128xf32>
    %22 = arith.addf %21, %16 : vector<8x128xf32>
    %23 = arith.truncf %22 : vector<8x128xf32> to vector<8x128xbf16>
    %c0_14 = arith.constant 0 : index
    %c0_15 = arith.constant 0 : index
    %24 = vector.load %arg7[%c0_14, %c0_15] : memref<128x128xbf16, #tpu.memory_space<vmem>>, vector<128x128xbf16>
    %cst_16 = arith.constant dense<0.000000e+00> : vector<8x128xf32>
    %25 = tpu.matmul %23, %24, %cst_16 {dimension_numbers = #tpu.dot_dimension_numbers<[1], [0], [0], [1], [0, 0, 1, 1], [], []>} : vector<8x128xbf16>, vector<128x128xbf16>, vector<8x128xf32> -> vector<8x128xf32>
    %c0_17 = arith.constant 0 : index
    %c0_18 = arith.constant 0 : index
    %26 = vector.load %arg8[%c0_17, %c0_18] : memref<1x128xf32, #tpu.memory_space<vmem>>, vector<1x128xf32>
    %27 = vector.broadcast %26 : vector<1x128xf32> to vector<8x128xf32>
    %28 = arith.addf %25, %27 : vector<8x128xf32>
    %cst_19 = arith.constant 0.000000e+00 : f32
    %29 = vector.broadcast %cst_19 : f32 to vector<8x128xf32>
    %30 = arith.maximumf %28, %29 : vector<8x128xf32>
    %31 = arith.truncf %30 : vector<8x128xf32> to vector<8x128xbf16>
    %c0_20 = arith.constant 0 : index
    %c0_21 = arith.constant 0 : index
    %32 = vector.load %arg9[%c0_20, %c0_21] : memref<128x128xbf16, #tpu.memory_space<vmem>>, vector<128x128xbf16>
    %cst_22 = arith.constant dense<0.000000e+00> : vector<8x128xf32>
    %33 = tpu.matmul %31, %32, %cst_22 {dimension_numbers = #tpu.dot_dimension_numbers<[1], [0], [0], [1], [0, 0, 1, 1], [], []>} : vector<8x128xbf16>, vector<128x128xbf16>, vector<8x128xf32> -> vector<8x128xf32>
    %c0_23 = arith.constant 0 : index
    %c0_24 = arith.constant 0 : index
    %34 = vector.load %arg10[%c0_23, %c0_24] : memref<1x128xf32, #tpu.memory_space<vmem>>, vector<1x128xf32>
    %35 = vector.broadcast %34 : vector<1x128xf32> to vector<8x128xf32>
    %36 = arith.addf %33, %35 : vector<8x128xf32>
    %37 = arith.negf %36 : vector<8x128xf32>
    %38 = math.exp %37 : vector<8x128xf32>
    %cst_25 = arith.constant 1.000000e+00 : f32
    %39 = vector.broadcast %cst_25 : f32 to vector<8x128xf32>
    %40 = arith.addf %39, %38 : vector<8x128xf32>
    %41 = arith.divf %39, %40 : vector<8x128xf32>
    %c0_26 = arith.constant 0 : index
    %c0_27 = arith.constant 0 : index
    %42 = vector.load %arg11[%c0_26, %c0_27] : memref<8x128xf32, #tpu.memory_space<vmem>>, vector<8x128xf32>
    tpu.vector_store %arg11[%c0_26, %c0_27], %41 {strides = array<i32>} : memref<8x128xf32, #tpu.memory_space<vmem>>, vector<8x128xf32>,
    %c0_28 = arith.constant 0 : index
    %c0_29 = arith.constant 0 : index
    %43 = vector.load %arg12[%c0_28, %c0_29] : memref<8x256xf32, #tpu.memory_space<vmem>>, vector<8x256xf32>
    tpu.vector_store %arg12[%c0_28, %c0_29], %15 {strides = array<i32>} : memref<8x256xf32, #tpu.memory_space<vmem>>, vector<8x256xf32>,
    return
  }
  func.func @transform_0(%arg0: i32) -> (i32, i32) {
    %c0_i32 = arith.constant 0 : i32
    %c0_i32_0 = arith.constant 0 : i32
    return %arg0, %c0_i32 : i32, i32
  }
  func.func @transform_1(%arg0: i32) -> (i32, i32) {
    %c0_i32 = arith.constant 0 : i32
    %c0_i32_0 = arith.constant 0 : i32
    return %arg0, %c0_i32 : i32, i32
  }
  func.func @transform_2(%arg0: i32) -> (i32, i32) {
    %c0_i32 = arith.constant 0 : i32
    %c0_i32_0 = arith.constant 0 : i32
    %c0_i32_1 = arith.constant 0 : i32
    return %c0_i32, %c0_i32_0 : i32, i32
  }
  func.func @transform_3(%arg0: i32) -> (i32, i32) {
    %c0_i32 = arith.constant 0 : i32
    %c0_i32_0 = arith.constant 0 : i32
    %c0_i32_1 = arith.constant 0 : i32
    return %c0_i32, %c0_i32_0 : i32, i32
  }
  func.func @transform_4(%arg0: i32) -> (i32, i32) {
    %c0_i32 = arith.constant 0 : i32
    %c0_i32_0 = arith.constant 0 : i32
    %c0_i32_1 = arith.constant 0 : i32
    return %c0_i32, %c0_i32_0 : i32, i32
  }
  func.func @transform_5(%arg0: i32) -> (i32, i32) {
    %c0_i32 = arith.constant 0 : i32
    %c0_i32_0 = arith.constant 0 : i32
    %c0_i32_1 = arith.constant 0 : i32
    return %c0_i32, %c0_i32_0 : i32, i32
  }
  func.func @transform_6(%arg0: i32) -> (i32, i32) {
    %c0_i32 = arith.constant 0 : i32
    %c0_i32_0 = arith.constant 0 : i32
    %c0_i32_1 = arith.constant 0 : i32
    return %c0_i32, %c0_i32_0 : i32, i32
  }
  func.func @transform_7(%arg0: i32) -> (i32, i32) {
    %c0_i32 = arith.constant 0 : i32
    %c0_i32_0 = arith.constant 0 : i32
    %c0_i32_1 = arith.constant 0 : i32
    return %c0_i32, %c0_i32_0 : i32, i32
  }
  func.func @transform_8(%arg0: i32) -> (i32, i32) {
    %c0_i32 = arith.constant 0 : i32
    %c0_i32_0 = arith.constant 0 : i32
    %c0_i32_1 = arith.constant 0 : i32
    return %c0_i32, %c0_i32_0 : i32, i32
  }
  func.func @transform_9(%arg0: i32) -> (i32, i32) {
    %c0_i32 = arith.constant 0 : i32
    %c0_i32_0 = arith.constant 0 : i32
    %c0_i32_1 = arith.constant 0 : i32
    return %c0_i32, %c0_i32_0 : i32, i32
  }
  func.func @transform_10(%arg0: i32) -> (i32, i32) {
    %c0_i32 = arith.constant 0 : i32
    %c0_i32_0 = arith.constant 0 : i32
    return %arg0, %c0_i32 : i32, i32
  }
  func.func @transform_11(%arg0: i32) -> (i32, i32) {
    %c0_i32 = arith.constant 0 : i32
    %c0_i32_0 = arith.constant 0 : i32
    return %arg0, %c0_i32 : i32, i32
  }
}

</mosaic_0001>

<bundles_post_ra>
// kernel: vae_forward.1
= control target key start
LH: loop header
LB: loop body
LE: loop exit
PB: predicated region body
PF: predicated region fallthrough
CT: control target
= control target key end

     0   :  { %17 = vsyncpa [#allocation3], 0  ;;  %s1065_s0 = inlined_call_operand.vmem [shape: f32[8,128], index: 0, kind: input, shape index: {}]   ;;  %s1066_s1 = inlined_call_operand.vmem [shape: f32[8,128], index: 1, kind: input, shape index: {}]   ;;  %s1067_s2 = inlined_call_operand.hbm [shape: bf16[128,128], index: 2, kind: input, shape index: {}]   ;;  %s1068_s3 = inlined_call_operand.vmem [shape: f32[1,128], index: 3, kind: input, shape index: {}]   ;;  %s1069_s4 = inlined_call_operand.hbm [shape: bf16[128,256], index: 4, kind: input, shape index: {}]   ;;  %s1070_s5 = inlined_call_operand.vmem [shape: f32[1,256], index: 5, kind: input, shape index: {}]   ;;  %s1071_s6 = inlined_call_operand.hbm [shape: bf16[128,128], index: 6, kind: input, shape index: {}]   ;;  %s1072_s7 = inlined_call_operand.vmem [shape: f32[1,128], index: 7, kind: input, shape index: {}]   ;;  %s1073_s8 = inlined_call_operand.hbm [shape: bf16[128,128], index: 8, kind: input, shape index: {}]   ;;  %s1074_s9 = inlined_call_operand.vmem [shape: f32[1,128], index: 9, kind: input, shape index: {}]   ;;  %s1075_s10 = inlined_call_operand.hbm [shape: f32[8,128], index: 10, kind: output, shape index: {0}]   ;;  %s1076_s11 = inlined_call_operand.vmem [shape: f32[8,256], index: 11, kind: output, shape index: {1}]  }
   0x1   :  { %18 = vsyncpa [#allocation6], 0 }
   0x2   :  { %19 = vsyncpa [#allocation9], 0 }
   0x3   :  { %20 = vsyncpa [#allocation4], 0  ;;  %s924_s17 = smov [#allocation5]  }
   0x4   :  { %s44_s18 = sshll.u32 %s924_s17, 4  ;;  %s45_s18 = int_to_ptr.vmem [resolvable:$true] %s44_s18 }
   0x5   :  { %s824_s19 = scalar_lea.vmem %s45_s18, 2048  ;;  %p829_p1 = scmp.lt.s32.totalorder %s45_s18, %s45_s18 }
   0x6   :  { %p825_p0 = scmp.ne.s32.totalorder %s45_s18, %s824_s19  ;;  %p830_p2 = scmp.lt.s32.totalorder %s824_s19, %s824_s19 }
   0x8   :  { %p831_p3 = por %p830_p2, %p829_p1 }
   0xa   :  { %p832_p4 = pnand %p831_p3, %p825_p0 }
   0xc   :  { %835 = shalt.err (!%p832_p4)
}
   0xd   :  { %s925_s20 = smov 128   ;;  %s926_s21 = smov 8  }
   0xe   :  { %50 = dma.hbm_to_vmem [thread:$0]  %s1069_s4, 2048, %s45_s18, [#allocation6], %s925_s20, %s925_s20, %s926_s21  }
   0xf   :  { %s927_s24 = smov [#allocation2]  }
  0x10   :  { %s30_s25 = sshll.u32 %s927_s24, 4  ;;  %s31_s25 = int_to_ptr.vmem [resolvable:$true] %s30_s25 }
  0x11   :  { %s844_s26 = scalar_lea.vmem %s31_s25, 1024  ;;  %p849_p6 = scmp.lt.s32.totalorder %s31_s25, %s31_s25 }
  0x12   :  { %p845_p5 = scmp.ne.s32.totalorder %s31_s25, %s844_s26  ;;  %p850_p7 = scmp.lt.s32.totalorder %s844_s26, %s844_s26 }
  0x14   :  { %p851_p8 = por %p850_p7, %p849_p6 }
  0x16   :  { %p852_p9 = pnand %p851_p8, %p845_p5 }
  0x18   :  { %855 = shalt.err (!%p852_p9)
}
  0x19   :  { %s928_s27 = smov 64   ;;  %s929_s28 = smov 4  }
  0x1a   :  { %36 = dma.hbm_to_vmem [thread:$0]  %s1067_s2, 1024, %s31_s25, [#allocation3], %s928_s27, %s928_s27, %s929_s28  }
  0x1b   :  { %s930_s12 = smov [#allocation7]   ;;  %s931_s14 = smov [#allocation8]  }
  0x1c   :  { %s58_s13 = sshll.u32 %s930_s12, 4  ;;  %s72_s4 = sshll.u32 %s931_s14, 4  ;;  %s59_s13 = int_to_ptr.vmem [resolvable:$true] %s58_s13  ;;  %s73_s4 = int_to_ptr.vmem [resolvable:$true] %s72_s4 }
  0x1d   :  { %s864_s15 = scalar_lea.vmem %s59_s13, 1024  ;;  %p869_p11 = scmp.lt.s32.totalorder %s59_s13, %s59_s13 }
  0x1e   :  { %p865_p10 = scmp.ne.s32.totalorder %s59_s13, %s864_s15  ;;  %p870_p12 = scmp.lt.s32.totalorder %s864_s15, %s864_s15 }
  0x20   :  { %p871_p13 = por %p870_p12, %p869_p11 }
  0x22   :  { %p872_p0 = pnand %p871_p13, %p865_p10 }
  0x24   :  { %875 = shalt.err (!%p872_p0)
}
  0x25   :  { %64 = dma.hbm_to_vmem [thread:$0]  %s1071_s6, 1024, %s59_s13, [#allocation6], %s928_s27, %s928_s27, %s929_s28  }
  0x26   :  { %s884_s18 = scalar_lea.vmem %s73_s4, 1024  ;;  %p889_p2 = scmp.lt.s32.totalorder %s73_s4, %s73_s4 }
  0x27   :  { %p885_p1 = scmp.ne.s32.totalorder %s73_s4, %s884_s18  ;;  %p890_p3 = scmp.lt.s32.totalorder %s884_s18, %s884_s18 }
  0x29   :  { %p891_p4 = por %p890_p3, %p889_p2 }
  0x2b   :  { %p892_p5 = pnand %p891_p4, %p885_p1 }
  0x2d   :  { %895 = shalt.err (!%p892_p5)
}
  0x2e   :  { %78 = dma.hbm_to_vmem [thread:$0]  %s1073_s8, 1024, %s73_s4, [#allocation9], %s928_s27, %s928_s27, %s929_s28  }
  0x2f   :  { %916 = dma.done.wait [#allocation3], 1024  }
  0x30   :  { %917 = vsyncadd [#allocation3], 4294966272 }
  0x31   :  { %918 = dma.done.wait [#allocation6], 3072  }
  0x32   :  { %919 = vsyncadd [#allocation6], 4294964224 }
  0x33   :  { %920 = dma.done.wait [#allocation9], 1024  }
  0x34   :  { %921 = vsyncadd [#allocation9], 4294966272  ;;  %v932_v0 = vmov 0.0   ;;  %vm933_vm0 = vmmov 0   ;;  %v762_v1 = vld [vmem:[#allocation2 + $0x38] sm:$0xff]   ;;  %v763_v2 = vld [vmem:[#allocation2 + $0x30] sm:$0xff]   ;;  %v228_v50 = vlaneseq }
  0x35   :  { %690 = vmatprep.subr.bf16.mxu0 %v932_v0  ;;  %706 = vmatprep.mubr.msk.bf16.mxu0 %vm933_vm0, %v932_v0  ;;  %v764_v3 = vld [vmem:[#allocation2 + $0x28] sm:$0xff]   ;;  %v770_v4 = vld [vmem:[#allocation5 + $0x74] ss:$8 sps:$4 sm:$0xff]   ;;  %v772_v5 = vld [vmem:[#allocation5 + $0x70] ss:$8 sps:$4 sm:$0xff]   ;;  %v934_v27 = vmov 0  }
  0x36   :  { %691 = vmatpush3.bf16.msra.mxu0 %v762_v1  ;;  %v765_v6 = vld [vmem:[#allocation2 + $0x20] sm:$0xff]   ;;  %318 = vmatprep.subr.bf16.mxu1 %v770_v4  ;;  %v776_v9 = vld [vmem:[#allocation5 + $0x54] ss:$8 sps:$4 sm:$0xff]   ;;  %v778_v11 = vld [vmem:[#allocation5 + $0x50] ss:$8 sps:$4 sm:$0xff]   ;;  %v229_v51 = vshrl.u32 %v228_v50, 7 }
  0x37   :  { %692 = vmatprep.subr.bf16.mxu0 %v932_v0  ;;  %v773_v7 = vld [vmem:[#allocation5 + $0x64] ss:$8 sps:$4 sm:$0xff]   ;;  %319 = vmatpush1.bf16.msra.mxu1 %v772_v5  ;;  %v775_v8 = vld [vmem:[#allocation5 + $0x60] ss:$8 sps:$4 sm:$0xff]   ;;  %v766_v10 = vld [vmem:[#allocation2 + $0x18] sm:$0xff]  }
  0x38   :  { %320 = vmatprep.subr.bf16.mxu1 %v773_v7  ;;  %v767_v12 = vld [vmem:[#allocation2 + $0x10] sm:$0xff]   ;;  %v779_v13 = vld [vmem:[#allocation5 + $0x44] ss:$8 sps:$4 sm:$0xff]   ;;  %v781_v14 = vld [vmem:[#allocation5 + $0x40] ss:$8 sps:$4 sm:$0xff]   ;;  %350 = vmatprep.mubr.bf16.mxu1 %v934_v27  ;;  %v230_v52 = vsub.s32 0, %v229_v51 }
  0x39   :  { %v782_v15 = vld [vmem:[#allocation5 + $0x34] ss:$8 sps:$4 sm:$0xff]   ;;  %v768_v16 = vld [vmem:[#allocation2 + $0x8] sm:$0xff]   ;;  %v784_v17 = vld [vmem:[#allocation5 + $0x30] ss:$8 sps:$4 sm:$0xff]   ;;  %v234_v54 = vsub.s32 1, %v229_v51 }
  0x3a   :  { %693 = vmatpush3.bf16.msra.mxu0 %v763_v2  ;;  %v785_v18 = vld [vmem:[#allocation5 + $0x24] ss:$8 sps:$4 sm:$0xff]   ;;  %v787_v21 = vld [vmem:[#allocation5 + $0x20] ss:$8 sps:$4 sm:$0xff]   ;;  %v788_v23 = vld [vmem:[#allocation5 + $0x14] ss:$8 sps:$4 sm:$0xff]  }
  0x3b   :  { %694 = vmatprep.subr.bf16.mxu0 %v932_v0  ;;  %321 = vmatpush1.bf16.msra.mxu1 %v775_v8  ;;  %v769_v19 = vld [vmem:[#allocation2] sm:$0xff]   ;;  %v790_v24 = vld [vmem:[#allocation5 + $0x10] ss:$8 sps:$4 sm:$0xff]   ;;  %v796_v38 = vld [vmem:[#allocation7 + $0x28] sm:$0xff]  }
  0x3c   :  { %322 = vmatprep.subr.bf16.mxu1 %v776_v9  ;;  %v94_v20 = vld [vmem:[%s1065_s0] sm:$0xff]  ;;  %v794_v28 = vld [vmem:[#allocation7 + $0x38] sm:$0xff]   ;;  %v795_v37 = vld [vmem:[#allocation7 + $0x30] sm:$0xff]  }
  0x3d   :  { %v95_v22 = vpack.c.bf16 %v94_v20, %v94_v20  ;;  %v791_v25 = vld [vmem:[#allocation5 + $0x4] ss:$8 sps:$4 sm:$0xff]   ;;  %v793_v26 = vld [vmem:[#allocation5] ss:$8 sps:$4 sm:$0xff]   ;;  %v798_v40 = vld [vmem:[#allocation7 + $0x18] sm:$0xff]  }
  0x3e   :  { %695 = vmatpush3.bf16.msra.mxu0 %v764_v3  ;;  %v619_v29 = vld [vmem:[%s1068_s3] ss:$0 sm:$0xff]  ;;  %v799_v41 = vld [vmem:[#allocation7 + $0x10] sm:$0xff]   ;;  %v800_v42 = vld [vmem:[#allocation7 + $0x8] sm:$0xff]  }
  0x3f   :  { %696 = vmatprep.subr.bf16.mxu0 %v932_v0  ;;  %323 = vmatpush1.bf16.msra.mxu1 %v778_v11  ;;  %v797_v39 = vld [vmem:[#allocation7 + $0x20] sm:$0xff]   ;;  %v802_v44 = vld [vmem:[#allocation8 + $0x38] sm:$0xff]   ;;  %v803_v45 = vld [vmem:[#allocation8 + $0x30] sm:$0xff]  }
  0x40   :  { %324 = vmatprep.subr.bf16.mxu1 %v779_v13  ;;  %v801_v43 = vld [vmem:[#allocation7] sm:$0xff]   ;;  %v804_v46 = vld [vmem:[#allocation8 + $0x28] sm:$0xff]   ;;  %v806_v48 = vld [vmem:[#allocation8 + $0x18] sm:$0xff]  }
  0x41   :  { %v805_v47 = vld [vmem:[#allocation8 + $0x20] sm:$0xff]   ;;  %v807_v49 = vld [vmem:[#allocation8 + $0x10] sm:$0xff]   ;;  %v808_v7 = vld [vmem:[#allocation8 + $0x8] sm:$0xff]  }
  0x42   :  { %697 = vmatpush3.bf16.msra.mxu0 %v765_v6  ;;  %v226_v53 = vld [vmem:[%s1070_s5] sm:$0x3] }
  0x43   :  { %698 = vmatprep.subr.bf16.mxu0 %v932_v0  ;;  %325 = vmatpush1.bf16.msra.mxu1 %v781_v14  ;;  %v231_v55 = vrot.slane %v226_v53, %v230_v52  ;;  %v235_v56 = vrot.slane %v226_v53, %v234_v54  ;;  %v96_v2 = vld [vmem:[%s1066_s1] sm:$0xff] }
  0x44   :  { %326 = vmatprep.subr.bf16.mxu1 %v782_v15  ;;  %v809_v8 = vld [vmem:[#allocation8] sm:$0xff]  }
  0x45   :  { %v644_v9 = vld [vmem:[%s1072_s7] ss:$0 sm:$0xff]  ;;  %s935_s7 = smov [#allocation10]  }
  0x46   :  { %699 = vmatpush3.bf16.msra.mxu0 %v766_v10  ;;  %s604_s29 = sshll.u32 %s935_s7, 4  ;;  %s605_s29 = int_to_ptr.vmem [resolvable:$true] %s604_s29 }
  0x47   :  { %700 = vmatprep.subr.bf16.mxu0 %v932_v0  ;;  %327 = vmatpush1.bf16.msra.mxu1 %v784_v17  ;;  %v653_v17 = vld [vmem:[%s1074_s9] ss:$0 sm:$0xff]  ;;  %s896_s30 = scalar_lea.vmem %s605_s29, 128  ;;  %p901_p7 = scmp.lt.s32.totalorder %s605_s29, %s605_s29 }
  0x48   :  { %328 = vmatprep.subr.bf16.mxu1 %v785_v18  ;;  %p897_p6 = scmp.ne.s32.totalorder %s605_s29, %s896_s30  ;;  %p902_p8 = scmp.lt.s32.totalorder %s896_s30, %s896_s30 }
  0x4a   :  { %701 = vmatpush3.bf16.msra.mxu0 %v767_v12  ;;  %p903_p9 = por %p902_p8, %p901_p7 }
  0x4b   :  { %702 = vmatprep.subr.bf16.mxu0 %v932_v0  ;;  %329 = vmatpush1.bf16.msra.mxu1 %v787_v21 }
  0x4c   :  { %330 = vmatprep.subr.bf16.mxu1 %v788_v23  ;;  %p904_p10 = pnand %p903_p9, %p897_p6 }
  0x4e   :  { %703 = vmatpush3.bf16.msra.mxu0 %v768_v16 }
  0x4f   :  { %704 = vmatprep.subr.bf16.mxu0 %v932_v0  ;;  %331 = vmatpush1.bf16.msra.mxu1 %v790_v24 }
  0x50   :  { %332 = vmatprep.subr.bf16.mxu1 %v791_v25 }
  0x52   :  { %705 = vmatpush3.bf16.msra.mxu0 %v769_v19 }
  0x53   :  { %710 = vmatprep.subr.bf16.mxu0 %v932_v0  ;;  %333 = vmatpush1.bf16.msra.mxu1 %v793_v26 }
  0x54   :  { %730 = vmatprep.subr.bf16.mxu1 %v932_v0 }
  0x55   :  { %707 = vmatmul.mubr.bf16.vlgmr.msra.gmra.mxu0 %v95_v22 }
  0x56   :  { %726 = vmatprep.mubr.msk.bf16.mxu0 %vm933_vm0, %v932_v0  ;;  %711 = vmatpush3.bf16.msra.mxu0 %v794_v28 }
  0x57   :  { %712 = vmatprep.subr.bf16.mxu0 %v932_v0 }
  0x5a   :  { %713 = vmatpush3.bf16.msra.mxu0 %v795_v37 }
  0x5b   :  { %714 = vmatprep.subr.bf16.mxu0 %v932_v0 }
  0x5e   :  { %715 = vmatpush3.bf16.msra.mxu0 %v796_v38 }
  0x5f   :  { %716 = vmatprep.subr.bf16.mxu0 %v932_v0 }
  0x62   :  { %717 = vmatpush3.bf16.msra.mxu0 %v797_v39 }
  0x63   :  { %718 = vmatprep.subr.bf16.mxu0 %v932_v0 }
  0x66   :  { %719 = vmatpush3.bf16.msra.mxu0 %v798_v40 }
  0x67   :  { %720 = vmatprep.subr.bf16.mxu0 %v932_v0 }
  0x6a   :  { %721 = vmatpush3.bf16.msra.mxu0 %v799_v41 }
  0x6b   :  { %722 = vmatprep.subr.bf16.mxu0 %v932_v0 }
  0x6e   :  { %723 = vmatpush3.bf16.msra.mxu0 %v800_v42 }
  0x6f   :  { %724 = vmatprep.subr.bf16.mxu0 %v932_v0 }
  0x72   :  { %725 = vmatpush3.bf16.msra.mxu0 %v801_v43 }
 0x115   :  { %v202_v30 = vpop.f32.mrf.mxu0 }
 0x116   :  { %v203_v31 = vadd.f32 %v619_v29, %v202_v30 }
 0x117   :  { %v708_v32 = vpop.f32.mrf.mxu0 }
 0x118   :  { %v208_v33 = vmax.f32 %v203_v31, 0.0 }
 0x119   :  { %v205_v34 = vpop.f32.mrf.mxu0 }
 0x11a   :  { %v209_v35 = vpack.c.bf16 %v208_v33, %v208_v33 }
 0x11b   :  { %v709_v36 = vpop.f32.mrf.mxu0 }
 0x11c   :  { %351 = vmatmul.mubr.bf16.vlgmr.msra.gmra.mxu1 %v209_v35 }
 0x11d   :  { %746 = vmatprep.mubr.msk.bf16.mxu1 %vm933_vm0, %v932_v0  ;;  %731 = vmatpush3.bf16.msra.mxu1 %v802_v44 }
 0x11e   :  { %732 = vmatprep.subr.bf16.mxu1 %v932_v0 }
 0x121   :  { %733 = vmatpush3.bf16.msra.mxu1 %v803_v45 }
 0x122   :  { %734 = vmatprep.subr.bf16.mxu1 %v932_v0 }
 0x125   :  { %735 = vmatpush3.bf16.msra.mxu1 %v804_v46 }
 0x126   :  { %736 = vmatprep.subr.bf16.mxu1 %v932_v0 }
 0x129   :  { %737 = vmatpush3.bf16.msra.mxu1 %v805_v47 }
 0x12a   :  { %738 = vmatprep.subr.bf16.mxu1 %v932_v0 }
 0x12d   :  { %739 = vmatpush3.bf16.msra.mxu1 %v806_v48 }
 0x12e   :  { %740 = vmatprep.subr.bf16.mxu1 %v932_v0 }
 0x131   :  { %741 = vmatpush3.bf16.msra.mxu1 %v807_v49 }
 0x132   :  { %742 = vmatprep.subr.bf16.mxu1 %v932_v0 }
 0x135   :  { %743 = vmatpush3.bf16.msra.mxu1 %v808_v7 }
 0x136   :  { %744 = vmatprep.subr.bf16.mxu1 %v932_v0 }
 0x139   :  { %745 = vmatpush3.bf16.msra.mxu1 %v809_v8 }
 0x1dc   :  { %v352_v57 = vpop.f32.mrf.mxu1 }
 0x1dd   :  { %v353_v58 = vadd.f32 %v352_v57, %v231_v55 }
 0x1de   :  { %v354_v59 = vpop.f32.mrf.mxu1 }
 0x1df   :  { %596 = vst [vmem:[%s1076_s11] sm:$0xff] %v353_v58  ;;  %v355_v60 = vadd.f32 %v354_v59, %v235_v56 }
 0x1e0   :  { %v356_v61 = vpop.f32.mrf.mxu1 }
 0x1e1   :  { %v359_v62 = vmul.f32 0.5, %v355_v60  ;;  %597 = vst [vmem:[%s1076_s11 + $0x8] sm:$0xff] %v355_v60 }
 0x1e2   :  { %v357_v63 = vpop.f32.mrf.mxu1 }
 0x1e3   :  { %v360_v1 = vmul.f32 1.442695, %v359_v62 }
 0x1e5   :  { %810 = vpow2.f32 %v360_v1 }
 0x1f2   :  { %v811_v3 = vpop.eup %810 }
 0x1f3   :  { %v362_v4 = vmul.f32 %v811_v3, %v96_v2 }
 0x1f5   :  { %v363_v5 = vadd.f32 %v362_v4, %v353_v58 }
 0x1f7   :  { %v364_v6 = vpack.c.bf16 %v363_v5, %v363_v5 }
 0x1f9   :  { %727 = vmatmul.mubr.bf16.vlgmr.msra.gmra.mxu0 %v364_v6 }
 0x2b9   :  { %v470_v10 = vpop.f32.mrf.mxu0 }
 0x2ba   :  { %v471_v11 = vadd.f32 %v644_v9, %v470_v10 }
 0x2bb   :  { %v728_v12 = vpop.f32.mrf.mxu0 }
 0x2bc   :  { %v476_v13 = vmax.f32 %v471_v11, 0.0 }
 0x2bd   :  { %v473_v14 = vpop.f32.mrf.mxu0 }
 0x2be   :  { %v477_v15 = vpack.c.bf16 %v476_v13, %v476_v13 }
 0x2bf   :  { %v729_v16 = vpop.f32.mrf.mxu0 }
 0x2c0   :  { %747 = vmatmul.mubr.bf16.vlgmr.msra.gmra.mxu1 %v477_v15 }
 0x380   :  { %v583_v18 = vpop.f32.mrf.mxu1 }
 0x381   :  { %v584_v0 = vadd.f32 %v653_v17, %v583_v18 }
 0x382   :  { %v748_v19 = vpop.f32.mrf.mxu1 }
 0x383   :  { %v662_v20 = vmul.f32 -1.442695, %v584_v0 }
 0x384   :  { %v586_v21 = vpop.f32.mrf.mxu1 }
 0x385   :  { %812 = vpow2.f32 %v662_v20 }
 0x386   :  { %v749_v22 = vpop.f32.mrf.mxu1 }
 0x392   :  { %v813_v23 = vpop.eup %812 }
 0x393   :  { %v592_v24 = vadd.f32 1.0, %v813_v23 }
 0x395   :  { %814 = vrcp.f32 %v592_v24 }
 0x3a2   :  { %v815_v25 = vpop.eup %814 }
 0x3a3   :  { %595 = vst [vmem:[#allocation10] sm:$0xff] %v815_v25 }
 0x3a4   :  { %907 = shalt.err (!%p904_p10)
}
 0x3a5   :  { %607 = dma.vmem_to_hbm [thread:$0]  %s605_s29, 128, %s1075_s10, [#allocation4]  }
 0x3a6   :  { %922 = dma.done.wait [#allocation4], 128  }
 0x3a7   :  { %923 = vsyncadd [#allocation4], 4294967168 }
 0x3a8   :  { %615 = vsyncpa [#allocation3], 1 }
 0x3a9   :  { %616 = vsyncpa [#allocation6], 1 }
 0x3aa   :  { %617 = vsyncpa [#allocation9], 1 }
 0x3ab   :  { %618 = vsyncpa [#allocation4], 1 }

// kernel: vae_forward.1
= control target key start
LH: loop header
LB: loop body
LE: loop exit
PB: predicated region body
PF: predicated region fallthrough
CT: control target
= control target key end

     0   :  { %17 = vsyncpa [#allocation3], 0  ;;  %s1065_s0 = inlined_call_operand.vmem [shape: f32[8,128], index: 0, kind: input, shape index: {}]   ;;  %s1066_s1 = inlined_call_operand.vmem [shape: f32[8,128], index: 1, kind: input, shape index: {}]   ;;  %s1067_s2 = inlined_call_operand.hbm [shape: bf16[128,128], index: 2, kind: input, shape index: {}]   ;;  %s1068_s3 = inlined_call_operand.vmem [shape: f32[1,128], index: 3, kind: input, shape index: {}]   ;;  %s1069_s4 = inlined_call_operand.hbm [shape: bf16[128,256], index: 4, kind: input, shape index: {}]   ;;  %s1070_s5 = inlined_call_operand.vmem [shape: f32[1,256], index: 5, kind: input, shape index: {}]   ;;  %s1071_s6 = inlined_call_operand.hbm [shape: bf16[128,128], index: 6, kind: input, shape index: {}]   ;;  %s1072_s7 = inlined_call_operand.vmem [shape: f32[1,128], index: 7, kind: input, shape index: {}]   ;;  %s1073_s8 = inlined_call_operand.hbm [shape: bf16[128,128], index: 8, kind: input, shape index: {}]   ;;  %s1074_s9 = inlined_call_operand.vmem [shape: f32[1,128], index: 9, kind: input, shape index: {}]   ;;  %s1075_s10 = inlined_call_operand.hbm [shape: f32[8,128], index: 10, kind: output, shape index: {0}]   ;;  %s1076_s11 = inlined_call_operand.vmem [shape: f32[8,256], index: 11, kind: output, shape index: {1}]  }
   0x1   :  { %18 = vsyncpa [#allocation6], 0 }
   0x2   :  { %19 = vsyncpa [#allocation9], 0 }
   0x3   :  { %20 = vsyncpa [#allocation4], 0  ;;  %s924_s17 = smov [#allocation5]  }
   0x4   :  { %s44_s18 = sshll.u32 %s924_s17, 4  ;;  %s45_s18 = int_to_ptr.vmem [resolvable:$true] %s44_s18 }
   0x5   :  { %s824_s19 = scalar_lea.vmem %s45_s18, 2048  ;;  %p829_p1 = scmp.lt.s32.totalorder %s45_s18, %s45_s18 }
   0x6   :  { %p825_p0 = scmp.ne.s32.totalorder %s45_s18, %s824_s19  ;;  %p830_p2 = scmp.lt.s32.totalorder %s824_s19, %s824_s19 }
   0x8   :  { %p831_p3 = por %p830_p2, %p829_p1 }
   0xa   :  { %p832_p4 = pnand %p831_p3, %p825_p0 }
   0xc   :  { %835 = shalt.err (!%p832_p4)
}
   0xd   :  { %s925_s20 = smov 128   ;;  %s926_s21 = smov 8  }
   0xe   :  { %50 = dma.hbm_to_vmem [thread:$0]  %s1069_s4, 2048, %s45_s18, [#allocation6], %s925_s20, %s925_s20, %s926_s21  }
   0xf   :  { %s927_s24 = smov [#allocation2]  }
  0x10   :  { %s30_s25 = sshll.u32 %s927_s24, 4  ;;  %s31_s25 = int_to_ptr.vmem [resolvable:$true] %s30_s25 }
  0x11   :  { %s844_s26 = scalar_lea.vmem %s31_s25, 1024  ;;  %p849_p6 = scmp.lt.s32.totalorder %s31_s25, %s31_s25 }
  0x12   :  { %p845_p5 = scmp.ne.s32.totalorder %s31_s25, %s844_s26  ;;  %p850_p7 = scmp.lt.s32.totalorder %s844_s26, %s844_s26 }
  0x14   :  { %p851_p8 = por %p850_p7, %p849_p6 }
  0x16   :  { %p852_p9 = pnand %p851_p8, %p845_p5 }
  0x18   :  { %855 = shalt.err (!%p852_p9)
}
  0x19   :  { %s928_s27 = smov 64   ;;  %s929_s28 = smov 4  }
  0x1a   :  { %36 = dma.hbm_to_vmem [thread:$0]  %s1067_s2, 1024, %s31_s25, [#allocation3], %s928_s27, %s928_s27, %s929_s28  }
  0x1b   :  { %s930_s12 = smov [#allocation7]   ;;  %s931_s14 = smov [#allocation8]  }
  0x1c   :  { %s58_s13 = sshll.u32 %s930_s12, 4  ;;  %s72_s4 = sshll.u32 %s931_s14, 4  ;;  %s59_s13 = int_to_ptr.vmem [resolvable:$true] %s58_s13  ;;  %s73_s4 = int_to_ptr.vmem [resolvable:$true] %s72_s4 }
  0x1d   :  { %s864_s15 = scalar_lea.vmem %s59_s13, 1024  ;;  %p869_p11 = scmp.lt.s32.totalorder %s59_s13, %s59_s13 }
  0x1e   :  { %p865_p10 = scmp.ne.s32.totalorder %s59_s13, %s864_s15  ;;  %p870_p12 = scmp.lt.s32.totalorder %s864_s15, %s864_s15 }
  0x20   :  { %p871_p13 = por %p870_p12, %p869_p11 }
  0x22   :  { %p872_p0 = pnand %p871_p13, %p865_p10 }
  0x24   :  { %875 = shalt.err (!%p872_p0)
}
  0x25   :  { %64 = dma.hbm_to_vmem [thread:$0]  %s1071_s6, 1024, %s59_s13, [#allocation6], %s928_s27, %s928_s27, %s929_s28  }
  0x26   :  { %s884_s18 = scalar_lea.vmem %s73_s4, 1024  ;;  %p889_p2 = scmp.lt.s32.totalorder %s73_s4, %s73_s4 }
  0x27   :  { %p885_p1 = scmp.ne.s32.totalorder %s73_s4, %s884_s18  ;;  %p890_p3 = scmp.lt.s32.totalorder %s884_s18, %s884_s18 }
  0x29   :  { %p891_p4 = por %p890_p3, %p889_p2 }
  0x2b   :  { %p892_p5 = pnand %p891_p4, %p885_p1 }
  0x2d   :  { %895 = shalt.err (!%p892_p5)
}
  0x2e   :  { %78 = dma.hbm_to_vmem [thread:$0]  %s1073_s8, 1024, %s73_s4, [#allocation9], %s928_s27, %s928_s27, %s929_s28  }
  0x2f   :  { %916 = dma.done.wait [#allocation3], 1024  }
  0x30   :  { %917 = vsyncadd [#allocation3], 4294966272 }
  0x31   :  { %918 = dma.done.wait [#allocation6], 3072  }
  0x32   :  { %919 = vsyncadd [#allocation6], 4294964224 }
  0x33   :  { %920 = dma.done.wait [#allocation9], 1024  }
  0x34   :  { %921 = vsyncadd [#allocation9], 4294966272  ;;  %v932_v0 = vmov 0.0   ;;  %vm933_vm0 = vmmov 0   ;;  %v762_v1 = vld [vmem:[#allocation2 + $0x38] sm:$0xff]   ;;  %v763_v2 = vld [vmem:[#allocation2 + $0x30] sm:$0xff]   ;;  %v228_v50 = vlaneseq }
  0x35   :  { %690 = vmatprep.subr.bf16.mxu0 %v932_v0  ;;  %706 = vmatprep.mubr.msk.bf16.mxu0 %vm933_vm0, %v932_v0  ;;  %v764_v3 = vld [vmem:[#allocation2 + $0x28] sm:$0xff]   ;;  %v770_v4 = vld [vmem:[#allocation5 + $0x74] ss:$8 sps:$4 sm:$0xff]   ;;  %v772_v5 = vld [vmem:[#allocation5 + $0x70] ss:$8 sps:$4 sm:$0xff]   ;;  %v934_v27 = vmov 0  }
  0x36   :  { %691 = vmatpush3.bf16.msra.mxu0 %v762_v1  ;;  %v765_v6 = vld [vmem:[#allocation2 + $0x20] sm:$0xff]   ;;  %318 = vmatprep.subr.bf16.mxu1 %v770_v4  ;;  %v776_v9 = vld [vmem:[#allocation5 + $0x54] ss:$8 sps:$4 sm:$0xff]   ;;  %v778_v11 = vld [vmem:[#allocation5 + $0x50] ss:$8 sps:$4 sm:$0xff]   ;;  %v229_v51 = vshrl.u32 %v228_v50, 7 }
  0x37   :  { %692 = vmatprep.subr.bf16.mxu0 %v932_v0  ;;  %v773_v7 = vld [vmem:[#allocation5 + $0x64] ss:$8 sps:$4 sm:$0xff]   ;;  %319 = vmatpush1.bf16.msra.mxu1 %v772_v5  ;;  %v775_v8 = vld [vmem:[#allocation5 + $0x60] ss:$8 sps:$4 sm:$0xff]   ;;  %v766_v10 = vld [vmem:[#allocation2 + $0x18] sm:$0xff]  }
  0x38   :  { %320 = vmatprep.subr.bf16.mxu1 %v773_v7  ;;  %v767_v12 = vld [vmem:[#allocation2 + $0x10] sm:$0xff]   ;;  %v779_v13 = vld [vmem:[#allocation5 + $0x44] ss:$8 sps:$4 sm:$0xff]   ;;  %v781_v14 = vld [vmem:[#allocation5 + $0x40] ss:$8 sps:$4 sm:$0xff]   ;;  %350 = vmatprep.mubr.bf16.mxu1 %v934_v27  ;;  %v230_v52 = vsub.s32 0, %v229_v51 }
  0x39   :  { %v782_v15 = vld [vmem:[#allocation5 + $0x34] ss:$8 sps:$4 sm:$0xff]   ;;  %v768_v16 = vld [vmem:[#allocation2 + $0x8] sm:$0xff]   ;;  %v784_v17 = vld [vmem:[#allocation5 + $0x30] ss:$8 sps:$4 sm:$0xff]   ;;  %v234_v54 = vsub.s32 1, %v229_v51 }
  0x3a   :  { %693 = vmatpush3.bf16.msra.mxu0 %v763_v2  ;;  %v785_v18 = vld [vmem:[#allocation5 + $0x24] ss:$8 sps:$4 sm:$0xff]   ;;  %v787_v21 = vld [vmem:[#allocation5 + $0x20] ss:$8 sps:$4 sm:$0xff]   ;;  %v788_v23 = vld [vmem:[#allocation5 + $0x14] ss:$8 sps:$4 sm:$0xff]  }
  0x3b   :  { %694 = vmatprep.subr.bf16.mxu0 %v932_v0  ;;  %321 = vmatpush1.bf16.msra.mxu1 %v775_v8  ;;  %v769_v19 = vld [vmem:[#allocation2] sm:$0xff]   ;;  %v790_v24 = vld [vmem:[#allocation5 + $0x10] ss:$8 sps:$4 sm:$0xff]   ;;  %v796_v38 = vld [vmem:[#allocation7 + $0x28] sm:$0xff]  }
  0x3c   :  { %322 = vmatprep.subr.bf16.mxu1 %v776_v9  ;;  %v94_v20 = vld [vmem:[%s1065_s0] sm:$0xff]  ;;  %v794_v28 = vld [vmem:[#allocation7 + $0x38] sm:$0xff]   ;;  %v795_v37 = vld [vmem:[#allocation7 + $0x30] sm:$0xff]  }
  0x3d   :  { %v95_v22 = vpack.c.bf16 %v94_v20, %v94_v20  ;;  %v791_v25 = vld [vmem:[#allocation5 + $0x4] ss:$8 sps:$4 sm:$0xff]   ;;  %v793_v26 = vld [vmem:[#allocation5] ss:$8 sps:$4 sm:$0xff]   ;;  %v798_v40 = vld [vmem:[#allocation7 + $0x18] sm:$0xff]  }
  0x3e   :  { %695 = vmatpush3.bf16.msra.mxu0 %v764_v3  ;;  %v619_v29 = vld [vmem:[%s1068_s3] ss:$0 sm:$0xff]  ;;  %v799_v41 = vld [vmem:[#allocation7 + $0x10] sm:$0xff]   ;;  %v800_v42 = vld [vmem:[#allocation7 + $0x8] sm:$0xff]  }
  0x3f   :  { %696 = vmatprep.subr.bf16.mxu0 %v932_v0  ;;  %323 = vmatpush1.bf16.msra.mxu1 %v778_v11  ;;  %v797_v39 = vld [vmem:[#allocation7 + $0x20] sm:$0xff]   ;;  %v802_v44 = vld [vmem:[#allocation8 + $0x38] sm:$0xff]   ;;  %v803_v45 = vld [vmem:[#allocation8 + $0x30] sm:$0xff]  }
  0x40   :  { %324 = vmatprep.subr.bf16.mxu1 %v779_v13  ;;  %v801_v43 = vld [vmem:[#allocation7] sm:$0xff]   ;;  %v804_v46 = vld [vmem:[#allocation8 + $0x28] sm:$0xff]   ;;  %v806_v48 = vld [vmem:[#allocation8 + $0x18] sm:$0xff]  }
  0x41   :  { %v805_v47 = vld [vmem:[#allocation8 + $0x20] sm:$0xff]   ;;  %v807_v49 = vld [vmem:[#allocation8 + $0x10] sm:$0xff]   ;;  %v808_v7 = vld [vmem:[#allocation8 + $0x8] sm:$0xff]  }
  0x42   :  { %697 = vmatpush3.bf16.msra.mxu0 %v765_v6  ;;  %v226_v53 = vld [vmem:[%s1070_s5] sm:$0x3] }
  0x43   :  { %698 = vmatprep.subr.bf16.mxu0 %v932_v0  ;;  %325 = vmatpush1.bf16.msra.mxu1 %v781_v14  ;;  %v231_v55 = vrot.slane %v226_v53, %v230_v52  ;;  %v235_v56 = vrot.slane %v226_v53, %v234_v54  ;;  %v96_v2 = vld [vmem:[%s1066_s1] sm:$0xff] }
  0x44   :  { %326 = vmatprep.subr.bf16.mxu1 %v782_v15  ;;  %v809_v8 = vld [vmem:[#allocation8] sm:$0xff]  }
  0x45   :  { %v644_v9 = vld [vmem:[%s1072_s7] ss:$0 sm:$0xff]  ;;  %s935_s7 = smov [#allocation10]  }
  0x46   :  { %699 = vmatpush3.bf16.msra.mxu0 %v766_v10  ;;  %s604_s29 = sshll.u32 %s935_s7, 4  ;;  %s605_s29 = int_to_ptr.vmem [resolvable:$true] %s604_s29 }
  0x47   :  { %700 = vmatprep.subr.bf16.mxu0 %v932_v0  ;;  %327 = vmatpush1.bf16.msra.mxu1 %v784_v17  ;;  %v653_v17 = vld [vmem:[%s1074_s9] ss:$0 sm:$0xff]  ;;  %s896_s30 = scalar_lea.vmem %s605_s29, 128  ;;  %p901_p7 = scmp.lt.s32.totalorder %s605_s29, %s605_s29 }
  0x48   :  { %328 = vmatprep.subr.bf16.mxu1 %v785_v18  ;;  %p897_p6 = scmp.ne.s32.totalorder %s605_s29, %s896_s30  ;;  %p902_p8 = scmp.lt.s32.totalorder %s896_s30, %s896_s30 }
  0x4a   :  { %701 = vmatpush3.bf16.msra.mxu0 %v767_v12  ;;  %p903_p9 = por %p902_p8, %p901_p7 }
  0x4b   :  { %702 = vmatprep.subr.bf16.mxu0 %v932_v0  ;;  %329 = vmatpush1.bf16.msra.mxu1 %v787_v21 }
  0x4c   :  { %330 = vmatprep.subr.bf16.mxu1 %v788_v23  ;;  %p904_p10 = pnand %p903_p9, %p897_p6 }
  0x4e   :  { %703 = vmatpush3.bf16.msra.mxu0 %v768_v16 }
  0x4f   :  { %704 = vmatprep.subr.bf16.mxu0 %v932_v0  ;;  %331 = vmatpush1.bf16.msra.mxu1 %v790_v24 }
  0x50   :  { %332 = vmatprep.subr.bf16.mxu1 %v791_v25 }
  0x52   :  { %705 = vmatpush3.bf16.msra.mxu0 %v769_v19 }
  0x53   :  { %710 = vmatprep.subr.bf16.mxu0 %v932_v0  ;;  %333 = vmatpush1.bf16.msra.mxu1 %v793_v26 }
  0x54   :  { %730 = vmatprep.subr.bf16.mxu1 %v932_v0 }
  0x55   :  { %707 = vmatmul.mubr.bf16.vlgmr.msra.gmra.mxu0 %v95_v22 }
  0x56   :  { %726 = vmatprep.mubr.msk.bf16.mxu0 %vm933_vm0, %v932_v0  ;;  %711 = vmatpush3.bf16.msra.mxu0 %v794_v28 }
  0x57   :  { %712 = vmatprep.subr.bf16.mxu0 %v932_v0 }
  0x5a   :  { %713 = vmatpush3.bf16.msra.mxu0 %v795_v37 }
  0x5b   :  { %714 = vmatprep.subr.bf16.mxu0 %v932_v0 }
  0x5e   :  { %715 = vmatpush3.bf16.msra.mxu0 %v796_v38 }
  0x5f   :  { %716 = vmatprep.subr.bf16.mxu0 %v932_v0 }
  0x62   :  { %717 = vmatpush3.bf16.msra.mxu0 %v797_v39 }
  0x63   :  { %718 = vmatprep.subr.bf16.mxu0 %v932_v0 }
  0x66   :  { %719 = vmatpush3.bf16.msra.mxu0 %v798_v40 }
  0x67   :  { %720 = vmatprep.subr.bf16.mxu0 %v932_v0 }
  0x6a   :  { %721 = vmatpush3.bf16.msra.mxu0 %v799_v41 }
  0x6b   :  { %722 = vmatprep.subr.bf16.mxu0 %v932_v0 }
  0x6e   :  { %723 = vmatpush3.bf16.msra.mxu0 %v800_v42 }
  0x6f   :  { %724 = vmatprep.subr.bf16.mxu0 %v932_v0 }
  0x72   :  { %725 = vmatpush3.bf16.msra.mxu0 %v801_v43 }
 0x115   :  { %v202_v30 = vpop.f32.mrf.mxu0 }
 0x116   :  { %v203_v31 = vadd.f32 %v619_v29, %v202_v30 }
 0x117   :  { %v708_v32 = vpop.f32.mrf.mxu0 }
 0x118   :  { %v208_v33 = vmax.f32 %v203_v31, 0.0 }
 0x119   :  { %v205_v34 = vpop.f32.mrf.mxu0 }
 0x11a   :  { %v209_v35 = vpack.c.bf16 %v208_v33, %v208_v33 }
 0x11b   :  { %v709_v36 = vpop.f32.mrf.mxu0 }
 0x11c   :  { %351 = vmatmul.mubr.bf16.vlgmr.msra.gmra.mxu1 %v209_v35 }
 0x11d   :  { %746 = vmatprep.mubr.msk.bf16.mxu1 %vm933_vm0, %v932_v0  ;;  %731 = vmatpush3.bf16.msra.mxu1 %v802_v44 }
 0x11e   :  { %732 = vmatprep.subr.bf16.mxu1 %v932_v0 }
 0x121   :  { %733 = vmatpush3.bf16.msra.mxu1 %v803_v45 }
 0x122   :  { %734 = vmatprep.subr.bf16.mxu1 %v932_v0 }
 0x125   :  { %735 = vmatpush3.bf16.msra.mxu1 %v804_v46 }
 0x126   :  { %736 = vmatprep.subr.bf16.mxu1 %v932_v0 }
 0x129   :  { %737 = vmatpush3.bf16.msra.mxu1 %v805_v47 }
 0x12a   :  { %738 = vmatprep.subr.bf16.mxu1 %v932_v0 }
 0x12d   :  { %739 = vmatpush3.bf16.msra.mxu1 %v806_v48 }
 0x12e   :  { %740 = vmatprep.subr.bf16.mxu1 %v932_v0 }
 0x131   :  { %741 = vmatpush3.bf16.msra.mxu1 %v807_v49 }
 0x132   :  { %742 = vmatprep.subr.bf16.mxu1 %v932_v0 }
 0x135   :  { %743 = vmatpush3.bf16.msra.mxu1 %v808_v7 }
 0x136   :  { %744 = vmatprep.subr.bf16.mxu1 %v932_v0 }
 0x139   :  { %745 = vmatpush3.bf16.msra.mxu1 %v809_v8 }
 0x1dc   :  { %v352_v57 = vpop.f32.mrf.mxu1 }
 0x1dd   :  { %v353_v58 = vadd.f32 %v352_v57, %v231_v55 }
 0x1de   :  { %v354_v59 = vpop.f32.mrf.mxu1 }
 0x1df   :  { %596 = vst [vmem:[%s1076_s11] sm:$0xff] %v353_v58  ;;  %v355_v60 = vadd.f32 %v354_v59, %v235_v56 }
 0x1e0   :  { %v356_v61 = vpop.f32.mrf.mxu1 }
 0x1e1   :  { %v359_v62 = vmul.f32 0.5, %v355_v60  ;;  %597 = vst [vmem:[%s1076_s11 + $0x8] sm:$0xff] %v355_v60 }
 0x1e2   :  { %v357_v63 = vpop.f32.mrf.mxu1 }
 0x1e3   :  { %v360_v1 = vmul.f32 1.442695, %v359_v62 }
 0x1e5   :  { %810 = vpow2.f32 %v360_v1 }
 0x1f2   :  { %v811_v3 = vpop.eup %810 }
 0x1f3   :  { %v362_v4 = vmul.f32 %v811_v3, %v96_v2 }
 0x1f5   :  { %v363_v5 = vadd.f32 %v362_v4, %v353_v58 }
 0x1f7   :  { %v364_v6 = vpack.c.bf16 %v363_v5, %v363_v5 }
 0x1f9   :  { %727 = vmatmul.mubr.bf16.vlgmr.msra.gmra.mxu0 %v364_v6 }
 0x2b9   :  { %v470_v10 = vpop.f32.mrf.mxu0 }
 0x2ba   :  { %v471_v11 = vadd.f32 %v644_v9, %v470_v10 }
 0x2bb   :  { %v728_v12 = vpop.f32.mrf.mxu0 }
 0x2bc   :  { %v476_v13 = vmax.f32 %v471_v11, 0.0 }
 0x2bd   :  { %v473_v14 = vpop.f32.mrf.mxu0 }
 0x2be   :  { %v477_v15 = vpack.c.bf16 %v476_v13, %v476_v13 }
 0x2bf   :  { %v729_v16 = vpop.f32.mrf.mxu0 }
 0x2c0   :  { %747 = vmatmul.mubr.bf16.vlgmr.msra.gmra.mxu1 %v477_v15 }
 0x380   :  { %v583_v18 = vpop.f32.mrf.mxu1 }
 0x381   :  { %v584_v0 = vadd.f32 %v653_v17, %v583_v18 }
 0x382   :  { %v748_v19 = vpop.f32.mrf.mxu1 }
 0x383   :  { %v662_v20 = vmul.f32 -1.442695, %v584_v0 }
 0x384   :  { %v586_v21 = vpop.f32.mrf.mxu1 }
 0x385   :  { %812 = vpow2.f32 %v662_v20 }
 0x386   :  { %v749_v22 = vpop.f32.mrf.mxu1 }
 0x392   :  { %v813_v23 = vpop.eup %812 }
 0x393   :  { %v592_v24 = vadd.f32 1.0, %v813_v23 }
 0x395   :  { %814 = vrcp.f32 %v592_v24 }
 0x3a2   :  { %v815_v25 = vpop.eup %814 }
 0x3a3   :  { %595 = vst [vmem:[#allocation10] sm:$0xff] %v815_v25 }
 0x3a4   :  { %907 = shalt.err (!%p904_p10)
}
 0x3a5   :  { %607 = dma.vmem_to_hbm [thread:$0]  %s605_s29, 128, %s1075_s10, [#allocation4]  }
 0x3a6   :  { %922 = dma.done.wait [#allocation4], 128  }
 0x3a7   :  { %923 = vsyncadd [#allocation4], 4294967168 }
 0x3a8   :  { %615 = vsyncpa [#allocation3], 1 }
 0x3a9   :  { %616 = vsyncpa [#allocation6], 1 }
 0x3aa   :  { %617 = vsyncpa [#allocation9], 1 }
 0x3ab   :  { %618 = vsyncpa [#allocation4], 1 }

</bundles_post_ra>
